<compile_context>
chip_gen: v7x
topology: tpu7x:2x2x1
jax: 0.10.0
libtpu: 0.0.40
codegen_flags: <defaults>
</compile_context>

<pallas_src>
import functools

import jax
import jax.numpy as jnp
from jax.experimental import pallas as pl
from jax.experimental.pallas import tpu as pltpu

_LANE = 128
_SUBLANE = 8
_MAX_BLOCK_M = 512                       # mem-bound tiles saturate HBM roofline ~512 rows
_VMEM_BUDGET = 48 * 1024 * 1024          # conservative: below v7x's 64 MiB physical per TC
_WEIGHT_RESIDENT_LIMIT = 24 * 1024 * 1024  # per review: K-tile beyond ~24-32 MiB resident weight


def _round_up(n, m):
    return ((n + m - 1) // m) * m


def _linear_kernel(x_ref, wt_ref, b_ref, o_ref):
    # In-kernel cast: MXU sees the weight's dtype (bf16 by default) for both
    # operands; accumulation is f32.  No wrapper-side cast pass over x.
    acc = jnp.dot(x_ref[...].astype(wt_ref.dtype), wt_ref[...],
                  preferred_element_type=jnp.float32)
    o_ref[...] = (acc + b_ref[...]).astype(o_ref.dtype)


def _linear_kernel_ktiled(x_ref, wt_ref, b_ref, o_ref, acc_ref):
    # Contraction axis k is the LAST grid dim ('arbitrary'); output block index
    # is constant over k, so o_ref / acc_ref stay resident across the k sweep.
    k = pl.program_id(1)

    @pl.when(k == 0)
    def _():
        acc_ref[...] = jnp.zeros_like(acc_ref)

    acc_ref[...] += jnp.dot(x_ref[...].astype(wt_ref.dtype), wt_ref[...],
                            preferred_element_type=jnp.float32)

    @pl.when(k == pl.num_programs(1) - 1)
    def _():
        o_ref[...] = (acc_ref[...] + b_ref[...]).astype(o_ref.dtype)


def prepare_params(weight, bias, *, lane_pad=_LANE, compute_dtype=jnp.bfloat16):
    """One-time (param-init time) preparation.

    - Transposes W (C, F) -> (F, C) so the kernel RHS is MXU-ready.
    - Zero-pads the class dim C to a multiple of `lane_pad` (128 lanes) so
      output stores are lane-dense.  NOTE: for tiny C this amplifies HBM write
      bytes by C_pad/C; pass out_dtype=jnp.bfloat16 to the forward to halve it.
    - Casts the weight to `compute_dtype` (default bf16 — the MXU fast path on
      v5e/v6e/v7x); the bias stays f32 for the f32 accumulate.

    Returns (wt_padded (F, C_pad), bias_padded (1, C_pad), n_classes).
    """
    C, F = weight.shape
    C_pad = _round_up(C, lane_pad)
    w_dtype = jnp.dtype(compute_dtype if compute_dtype is not None else weight.dtype)
    wt = jnp.zeros((F, C_pad), dtype=w_dtype)
    wt = wt.at[:, :C].set(weight.T.astype(w_dtype))
    b2 = jnp.zeros((1, C_pad), dtype=jnp.float32)
    b2 = b2.at[:, :C].set(bias.astype(jnp.float32))
    return wt, b2, C


def impf_dnamlp_forward(x, wt_padded, bias_padded, n_classes, *,
                        block_m=None, block_k=None, x_buffers=2,
                        out_dtype=None):
    """Forward pass: returns (B, n_classes) = x @ W.T + b.

    x:           (B, in_features)            -- any float dtype; cast in-kernel
    wt_padded:   (in_features, C_pad)        -- from prepare_params
    bias_padded: (1, C_pad)  f32             -- from prepare_params
    """
    B, F = x.shape
    F_w, C_pad = wt_padded.shape
    assert F == F_w, "in_features mismatch between x and prepared weight"
    out_dtype = x.dtype if out_dtype is None else jnp.dtype(out_dtype)

    w_item = wt_padded.dtype.itemsize
    x_item = x.dtype.itemsize
    o_item = jnp.dtype(out_dtype).itemsize

    # --- K-tiling decision: stream the weight over a trailing 'arbitrary'
    # contraction axis once it is too big to keep resident in VMEM. ---
    w_bytes = F * C_pad * w_item
    if block_k is None and w_bytes > _WEIGHT_RESIDENT_LIMIT and F % _LANE == 0:
        max_tk = max(_LANE,
                     (_WEIGHT_RESIDENT_LIMIT // (2 * C_pad * w_item)) // _LANE * _LANE)
        tk = max_tk
        while F % tk != 0:
            tk -= _LANE
        block_k = tk
    # TODO(synk): zero-pad F in prepare_params when a huge in_features is not a
    # multiple of 128 so K-tiling can still engage for that case.
    if block_k is not None:
        assert block_k % _LANE == 0 or block_k == F
        assert F % block_k == 0, "K tiling requires block_k to divide in_features"

    # --- VMEM accounting (2x buffers assumed for every pipelined operand). ---
    k_extent = block_k if block_k is not None else F
    fixed = 2 * k_extent * C_pad * w_item + 2 * _SUBLANE * C_pad * 4      # weight + bias
    per_row = x_buffers * k_extent * x_item + 2 * C_pad * o_item          # x + out streams
    if block_k is not None:
        per_row += C_pad * 4                                              # f32 accumulator

    # --- Batch tile: as fat as the VMEM budget allows (fewer grid steps for a
    # mem-bound streaming linear), but keep >= 2 steps so v7x's second TC is
    # used when the batch allows it. ---
    if block_m is not None:
        tm = block_m
    else:
        avail = max(_VMEM_BUDGET - fixed, _SUBLANE * per_row)
        tm_cap = max(_SUBLANE, min(_MAX_BLOCK_M, (avail // per_row) // _SUBLANE * _SUBLANE))
        if B <= _SUBLANE:
            tm = B                              # block == full batch dim (allowed)
        else:
            tm = min(tm_cap, _round_up(B, _SUBLANE))
            if pl.cdiv(B, tm) < 2:              # v7x megacore: need >= 2 grid steps
                tm = max(_SUBLANE, _round_up(pl.cdiv(B, 2), _SUBLANE))

    grid_m = pl.cdiv(B, tm)                     # no jnp.pad: partial last tile is
                                                # handled by Pallas boundary masking;
                                                # OOB rows are never reduced across.

    need = fixed + tm * per_row
    vmem_limit = int(min(64 * 1024 * 1024, max(16 * 1024 * 1024, need * 3 // 2)))

    # Deeper buffering of the only streaming input, if requested (cheap sweep
    # when profiling shows exposed x-tile DMA).
    x_kwargs = {} if x_buffers == 2 else {"pipeline_mode": pl.Buffered(int(x_buffers))}

    if block_k is None:
        grid = (grid_m,)
        in_specs = [
            pl.BlockSpec((tm, F), lambda i: (i, 0), **x_kwargs),   # x streams over batch
            pl.BlockSpec((F, C_pad), lambda i: (0, 0)),            # weight resident
            pl.BlockSpec((1, C_pad), lambda i: (0, 0)),            # bias resident
        ]
        out_specs = pl.BlockSpec((tm, C_pad), lambda i: (i, 0))
        scratch_shapes = []
        kernel = _linear_kernel
        dims = ("parallel",)
    else:
        grid = (grid_m, F // block_k)                              # reduction axis LAST
        in_specs = [
            pl.BlockSpec((tm, block_k), lambda i, k: (i, k), **x_kwargs),
            pl.BlockSpec((block_k, C_pad), lambda i, k: (k, 0)),
            pl.BlockSpec((1, C_pad), lambda i, k: (0, 0)),
        ]
        out_specs = pl.BlockSpec((tm, C_pad), lambda i, k: (i, 0))
        scratch_shapes = [pltpu.VMEM((tm, C_pad), jnp.float32)]
        kernel = _linear_kernel_ktiled
        dims = ("parallel", "arbitrary")

    out = pl.pallas_call(
        kernel,
        out_shape=jax.ShapeDtypeStruct((B, C_pad), out_dtype),
        grid=grid,
        in_specs=in_specs,
        out_specs=out_specs,
        scratch_shapes=scratch_shapes,
        compiler_params=pltpu.CompilerParams(
            dimension_semantics=dims,
            vmem_limit_bytes=vmem_limit,
        ),
    )(x, wt_padded, bias_padded)

    # Strip the class-dim lane padding outside the kernel.
    return out[:, :n_classes]


if __name__ == "__main__":
    key = jax.random.PRNGKey(0)
    k1, k2, k3, k4, k5, k6 = jax.random.split(key, 6)

    # --- Check 1: default bf16-MXU path, tiny batch (module-sized shapes). ---
    in_features, n_classes, batch = 32, 8, 2
    x = jax.random.normal(k1, (batch, in_features), dtype=jnp.float32)
    bound = 1.0 / (in_features ** 0.5)      # nn.Linear default init
    weight = jax.random.uniform(k2, (n_classes, in_features),
                                minval=-bound, maxval=bound, dtype=jnp.float32)
    bias = jax.random.uniform(k3, (n_classes,),
                              minval=-bound, maxval=bound, dtype=jnp.float32)

    wt_p, b_p, _ = prepare_params(weight, bias)          # bf16 weights by default
    fwd = jax.jit(functools.partial(impf_dnamlp_forward, n_classes=n_classes))
    y = jax.block_until_ready(fwd(x, wt_p, b_p))
    y_ref = x @ weight.T + bias
    assert y.shape == (batch, n_classes)
    # bf16 MXU inputs with f32 accumulation: loosened tolerance (expected).
    assert jnp.allclose(y, y_ref, atol=2e-2, rtol=2e-2), "bf16 path mismatch"

    # --- Check 2: f32 path, forced K-tiled contraction axis + partial last
    # batch tile, validating the large-weight code path end to end. ---
    in_features2, n_classes2, batch2 = 256, 8, 20
    x2 = jax.random.normal(k4, (batch2, in_features2), dtype=jnp.float32)
    bound2 = 1.0 / (in_features2 ** 0.5)
    weight2 = jax.random.uniform(k5, (n_classes2, in_features2),
                                 minval=-bound2, maxval=bound2, dtype=jnp.float32)
    bias2 = jax.random.uniform(k6, (n_classes2,),
                               minval=-bound2, maxval=bound2, dtype=jnp.float32)

    wt_p2, b_p2, _ = prepare_params(weight2, bias2, compute_dtype=jnp.float32)
    fwd2 = jax.jit(functools.partial(
        impf_dnamlp_forward, n_classes=n_classes2, block_m=8, block_k=128))
    y2 = jax.block_until_ready(fwd2(x2, wt_p2, b_p2))
    y2_ref = x2 @ weight2.T + bias2
    assert y2.shape == (batch2, n_classes2)
    assert jnp.allclose(y2, y2_ref, atol=1e-4, rtol=1e-4), "K-tiled f32 path mismatch"

    print("KERNEL_OK")
</pallas_src>

<mosaic_0001>
module attributes {stable_mosaic.version = 11 : i64} {
  func.func @_linear_kernel(%arg0: i32, %arg1: memref<2x32xf32, #tpu.memory_space<vmem>>, %arg2: memref<32x128xbf16, #tpu.memory_space<vmem>>, %arg3: memref<1x128xf32, #tpu.memory_space<vmem>>, %arg4: memref<2x128xf32, #tpu.memory_space<vmem>>) attributes {dimension_semantics = [#tpu.dimension_semantics<parallel>], iteration_bounds = array<i64: 1>, scalar_prefetch = 0 : i64, scratch_operands = 0 : i64, tpu.core_type = #tpu.core_type<tc>, window_params = [{transform_indices = @transform_0, window_bounds = array<i64: 2, 32>}, {pipeline_mode = #tpu.pipeline_mode<synchronous>, transform_indices = @transform_1, window_bounds = array<i64: 32, 128>}, {pipeline_mode = #tpu.pipeline_mode<synchronous>, transform_indices = @transform_2, window_bounds = array<i64: 1, 128>}, {transform_indices = @transform_3, window_bounds = array<i64: 2, 128>}]} {
    %c0 = arith.constant 0 : index
    %c0_0 = arith.constant 0 : index
    %0 = vector.load %arg1[%c0, %c0_0] : memref<2x32xf32, #tpu.memory_space<vmem>>, vector<2x32xf32>
    %1 = arith.truncf %0 : vector<2x32xf32> to vector<2x32xbf16>
    %c0_1 = arith.constant 0 : index
    %c0_2 = arith.constant 0 : index
    %2 = vector.load %arg2[%c0_1, %c0_2] : memref<32x128xbf16, #tpu.memory_space<vmem>>, vector<32x128xbf16>
    %cst = arith.constant dense<0.000000e+00> : vector<2x128xf32>
    %3 = tpu.matmul %1, %2, %cst {dimension_numbers = #tpu.dot_dimension_numbers<[1], [0], [0], [1], [0, 0, 1, 1], [], []>} : vector<2x32xbf16>, vector<32x128xbf16>, vector<2x128xf32> -> vector<2x128xf32>
    %c0_3 = arith.constant 0 : index
    %c0_4 = arith.constant 0 : index
    %4 = vector.load %arg3[%c0_3, %c0_4] : memref<1x128xf32, #tpu.memory_space<vmem>>, vector<1x128xf32>
    %5 = vector.broadcast %4 : vector<1x128xf32> to vector<2x128xf32>
    %6 = arith.addf %3, %5 : vector<2x128xf32>
    %c0_5 = arith.constant 0 : index
    %c0_6 = arith.constant 0 : index
    %7 = vector.load %arg4[%c0_5, %c0_6] : memref<2x128xf32, #tpu.memory_space<vmem>>, vector<2x128xf32>
    tpu.vector_store %arg4[%c0_5, %c0_6], %6 {strides = array<i32>} : memref<2x128xf32, #tpu.memory_space<vmem>>, vector<2x128xf32>,
    return
  }
  func.func @transform_0(%arg0: i32) -> (i32, i32) {
    %c0_i32 = arith.constant 0 : i32
    %c0_i32_0 = arith.constant 0 : i32
    return %arg0, %c0_i32 : i32, i32
  }
  func.func @transform_1(%arg0: i32) -> (i32, i32) {
    %c0_i32 = arith.constant 0 : i32
    %c0_i32_0 = arith.constant 0 : i32
    %c0_i32_1 = arith.constant 0 : i32
    return %c0_i32, %c0_i32_0 : i32, i32
  }
  func.func @transform_2(%arg0: i32) -> (i32, i32) {
    %c0_i32 = arith.constant 0 : i32
    %c0_i32_0 = arith.constant 0 : i32
    %c0_i32_1 = arith.constant 0 : i32
    return %c0_i32, %c0_i32_0 : i32, i32
  }
  func.func @transform_3(%arg0: i32) -> (i32, i32) {
    %c0_i32 = arith.constant 0 : i32
    %c0_i32_0 = arith.constant 0 : i32
    return %arg0, %c0_i32 : i32, i32
  }
}

</mosaic_0001>

<bundles_post_ra>
// kernel: impf_dnamlp_forward.1
= control target key start
LH: loop header
LB: loop body
LE: loop exit
PB: predicated region body
PF: predicated region fallthrough
CT: control target
= control target key end

     0   :  { %8 = vsyncpa [#allocation3], 0  ;;  %s297_s0 = inlined_call_operand.hbm [shape: f32[2,32], index: 0, kind: input, shape index: {}]   ;;  %s298_s1 = inlined_call_operand.hbm [shape: bf16[32,128], index: 1, kind: input, shape index: {}]   ;;  %s299_s2 = inlined_call_operand.vmem [shape: f32[1,128], index: 2, kind: input, shape index: {}]   ;;  %s300_s3 = inlined_call_operand.hbm [shape: f32[2,128], index: 3, kind: output, shape index: {}]  }
   0x1   :  { %9 = vsyncpa [#allocation6], 0 }
   0x2   :  { %10 = vsyncpa [#allocation4], 0  ;;  %s224_s12 = smov [#allocation2]   ;;  %s225_s14 = smov [#allocation5]  }
   0x3   :  { %s17_s13 = sshll.u32 %s224_s12, 4  ;;  %s26_s15 = sshll.u32 %s225_s14, 4  ;;  %s18_s13 = int_to_ptr.vmem [resolvable:$true] %s17_s13  ;;  %s251_s15 = int_to_ptr.vmem [resolvable:$true] %s26_s15 }
   0x4   :  { %s152_s18 = scalar_lea.hbm %s297_s0, 32 }
   0x5   :  { %p153_p0 = scmp.ne.s32.totalorder %s297_s0, %s152_s18  ;;  %p156_p1 = scmp.lt.u32.totalorder %s152_s18, %s297_s0 }
   0x7   :  { %p158_p2 = pnand %p156_p1, %p153_p0 }
   0x9   :  { %161 = shalt.err (!%p158_p2)
}
   0xa   :  { %s162_s23 = scalar_lea.vmem %s18_s13, 32  ;;  %p167_p4 = scmp.lt.s32.totalorder %s18_s13, %s18_s13 }
   0xb   :  { %p163_p3 = scmp.ne.s32.totalorder %s18_s13, %s162_s23  ;;  %p168_p5 = scmp.lt.s32.totalorder %s162_s23, %s162_s23 }
   0xd   :  { %p169_p6 = por %p168_p5, %p167_p4 }
   0xf   :  { %p170_p7 = pnand %p169_p6, %p163_p3 }
  0x11   :  { %173 = shalt.err (!%p170_p7)
}
  0x12   :  { %20 = dma.hbm_to_vmem [thread:$0]  %s297_s0, 32, %s18_s13, [#allocation3]  }
  0x13   :  { %s174_s28 = scalar_lea.hbm %s298_s1, 256 }
  0x14   :  { %p175_p8 = scmp.ne.s32.totalorder %s298_s1, %s174_s28  ;;  %p178_p9 = scmp.lt.u32.totalorder %s174_s28, %s298_s1 }
  0x16   :  { %p180_p10 = pnand %p178_p9, %p175_p8 }
  0x18   :  { %183 = shalt.err (!%p180_p10)
}
  0x19   :  { %s184_s6 = scalar_lea.vmem %s251_s15, 256  ;;  %p189_p12 = scmp.lt.s32.totalorder %s251_s15, %s251_s15 }
  0x1a   :  { %p185_p11 = scmp.ne.s32.totalorder %s251_s15, %s184_s6  ;;  %p190_p13 = scmp.lt.s32.totalorder %s184_s6, %s184_s6 }
  0x1c   :  { %p191_p0 = por %p190_p13, %p189_p12 }
  0x1e   :  { %p192_p1 = pnand %p191_p0, %p185_p11 }
  0x20   :  { %195 = shalt.err (!%p192_p1)
}
  0x21   :  { %s226_s0 = smov 64   ;;  %s227_s7 = smov 4  }
  0x22   :  { %32 = dma.hbm_to_vmem [thread:$0]  %s298_s1, 256, %s251_s15, [#allocation6], %s226_s0, %s226_s0, %s227_s7  }
  0x23   :  { %218 = dma.done.wait [#allocation3], 32  }
  0x24   :  { %219 = vsyncadd [#allocation3], 4294967264 }
  0x25   :  { %220 = dma.done.wait [#allocation6], 256  }
  0x26   :  { %221 = vsyncadd [#allocation6], 4294967040  ;;  %v228_v0 = vmov 0.0   ;;  %vm229_vm0 = vmmov 0   ;;  %v150_v1 = vld [vmem:[#allocation5] sm:$0xff]   ;;  %v151_v2 = vld [vmem:[#allocation5 + $0x8] sm:$0xff]  }
  0x27   :  { %135 = vmatprep.subr.bf16.mxu0 %v228_v0  ;;  %139 = vmatprep.mubr.msk.bf16.mxu0 %vm229_vm0, %v228_v0  ;;  %v42_v3 = vld [vmem:[#allocation2] sm:$0x3]  ;;  %vm67_vm1 = vcmask 261120   ;;  %s230_s1 = smov [#allocation7]  }
  0x28   :  { %136 = vmatpush3.bf16.msra.mxu0 %v150_v1  ;;  %v43_v4 = vpack.c.bf16 %v42_v3, %v42_v3  ;;  %v128_v5 = vld [vmem:[%s299_s2] ss:$0 sm:$0xff]  ;;  %s118_s12 = sshll.u32 %s230_s1, 4  ;;  %s119_s12 = int_to_ptr.vmem [resolvable:$true] %s118_s12 }
  0x29   :  { %137 = vmatprep.subr.bf16.mxu0 %v228_v0  ;;  %s196_s13 = scalar_lea.vmem %s119_s12, 32  ;;  %p201_p3 = scmp.lt.s32.totalorder %s119_s12, %s119_s12 }
  0x2a   :  { %p197_p2 = scmp.ne.s32.totalorder %s119_s12, %s196_s13  ;;  %p202_p4 = scmp.lt.s32.totalorder %s196_s13, %s196_s13 }
  0x2c   :  { %138 = vmatpush3.bf16.msra.mxu0 %v151_v2  ;;  %p203_p5 = por %p202_p4, %p201_p3 }
  0x2e   :  { %p204_p6 = pnand %p203_p5, %p197_p2 }
  0x2f   :  { %140 = vmatmul.mubr.msk.bf16.vlgmr.msra.gmra.mrb[0].mxu0 %vm67_vm1, %v43_v4 }
 0x102   :  { %v105_v6 = vpop.f32.mrb[0].mxu0 }
 0x103   :  { %v106_v7 = vadd.f32 %v128_v5, %v105_v6  ;;  %v141_v8 = vpop.f32.mrb[1].mxu0 }
 0x104   :  { %v108_v9 = vpop.f32.mrb[2].mxu0 }
 0x105   :  { %111 = vst [vmem:[#allocation7] sm:$0x3] %v106_v7  ;;  %v142_v10 = vpop.f32.mrb[3].mxu0 }
 0x106   :  { %207 = shalt.err (!%p204_p6)
}
 0x107   :  { %s208_s2 = scalar_lea.hbm %s300_s3, 32 }
 0x108   :  { %p209_p7 = scmp.ne.s32.totalorder %s300_s3, %s208_s2  ;;  %p212_p8 = scmp.lt.u32.totalorder %s208_s2, %s300_s3 }
 0x10a   :  { %p214_p9 = pnand %p212_p8, %p209_p7 }
 0x10c   :  { %217 = shalt.err (!%p214_p9)
}
 0x10d   :  { %121 = dma.vmem_to_hbm [thread:$0]  %s119_s12, 32, %s300_s3, [#allocation4]  }
 0x10e   :  { %222 = dma.done.wait [#allocation4], 32  }
 0x10f   :  { %223 = vsyncadd [#allocation4], 4294967264 }
 0x110   :  { %125 = vsyncpa [#allocation3], 1 }
 0x111   :  { %126 = vsyncpa [#allocation6], 1 }
 0x112   :  { %127 = vsyncpa [#allocation4], 1 }

</bundles_post_ra>
